<compile_context>
chip_gen: v7x
topology: tpu7x:2x2x1
jax: 0.10.0
libtpu: 0.0.40
codegen_flags: <defaults>
</compile_context>

<pallas_src>
import functools

import jax
import jax.numpy as jnp
from jax import lax
from jax.experimental import pallas as pl
from jax.experimental.pallas import tpu as pltpu


def _deconv_relu_kernel(x_ref, w_ref, b_ref, o_ref):
    # x_ref: (Cin, TM)        spatial tile of one batch element (native NCDHW)
    # w_ref: (s^3*Cout, Cin)  fused deconv weight slab (resident in VMEM)
    # b_ref: (s^3*Cout, 1)    bias replicated over the s^3 kernel positions (f32)
    # o_ref: (s^3*Cout, TM)   output tile; lane dim = TM -> unmasked wide stores
    acc = jnp.dot(w_ref[...], x_ref[...], preferred_element_type=jnp.float32)
    acc = acc + b_ref[...]                      # f32 epilogue (v5e VPU has no bf16)
    o_ref[...] = jnp.maximum(acc, 0.0).astype(o_ref.dtype)


def upsampling_deconv_block_forward(x, w, b, *, stride=2, tile_m=512,
                                    compute_dtype=jnp.bfloat16,
                                    out_dtype=jnp.bfloat16):
    """ConvTranspose3d(kernel=stride, stride=stride, padding=0) + ReLU.

    x: (N, Cin, D, H, W)      PyTorch NCDHW layout (any float dtype)
    w: (Cin, Cout, s, s, s)   PyTorch ConvTranspose3d weight layout
    b: (Cout,)
    Returns (N, Cout, s*D, s*H, s*W) in `out_dtype`.
    """
    n, cin, d, h, w_sp = x.shape
    cout = w.shape[1]
    s = stride
    s3 = s * s * s
    s3c = s3 * cout
    dhw = d * h * w_sp

    # --- fused weight / bias (tiny, done once in the wrapper) ----------------
    # (Cin, Cout, kd, kh, kw) -> (kd, kh, kw, Cout, Cin) -> (s^3*Cout, Cin)
    w_t = jnp.transpose(w, (2, 3, 4, 1, 0)).reshape(s3c, cin).astype(compute_dtype)
    b_t = jnp.tile(b, s3).reshape(s3c, 1).astype(jnp.float32)

    # --- input: native NCDHW, NO transpose; read from HBM exactly once -------
    # (If the previous layer already produces bf16, the cast is a no-op.)
    x_flat = x.reshape(n, cin, dhw).astype(compute_dtype)

    # Spatial tile size: multiple of 128, and keep >= 2 total grid steps so
    # ("parallel", "parallel") can split work across v7x's two TensorCores.
    tile_m = max(128, (int(tile_m) // 128) * 128)
    tile_m = min(tile_m, pl.cdiv(dhw, 128) * 128)
    while n * pl.cdiv(dhw, tile_m) < 2 and tile_m > 128:
        tile_m = max(128, ((tile_m // 2) // 128) * 128)

    dhw_pad = pl.cdiv(dhw, tile_m) * tile_m
    if dhw_pad != dhw:
        # Padded columns compute ReLU(bias) garbage; sliced off after the call.
        x_flat = jnp.pad(x_flat, ((0, 0), (0, 0), (0, dhw_pad - dhw)))

    # --- VMEM budget: double-buffered in/out tiles + resident weight/bias ----
    in_item = jnp.dtype(compute_dtype).itemsize
    out_item = jnp.dtype(out_dtype).itemsize
    est_vmem = (2 * tile_m * (cin * in_item + s3c * out_item)
                + 2 * (s3c * cin * in_item + s3c * 4))
    # Leave headroom but stay under v7x's 64 MiB physical VMEM per TensorCore.
    vmem_limit = int(min(48 * 1024 * 1024,
                         max(16 * 1024 * 1024, 2 * est_vmem)))

    out = pl.pallas_call(
        _deconv_relu_kernel,
        out_shape=jax.ShapeDtypeStruct((n, s3c, dhw_pad), out_dtype),
        grid=(n, dhw_pad // tile_m),
        in_specs=[
            pl.BlockSpec((pl.Squeezed(), cin, tile_m), lambda nb, j: (nb, 0, j)),
            # Constant index_map -> weight / bias stay resident in VMEM.
            pl.BlockSpec((s3c, cin), lambda nb, j: (0, 0)),
            pl.BlockSpec((s3c, 1), lambda nb, j: (0, 0)),
        ],
        out_specs=pl.BlockSpec((pl.Squeezed(), s3c, tile_m),
                               lambda nb, j: (nb, 0, j)),
        compiler_params=pltpu.CompilerParams(
            dimension_semantics=("parallel", "parallel"),
            vmem_limit_bytes=vmem_limit,
        ),
    )(x_flat, w_t, b_t)

    # --- single fused layout pass back to NCDHW -------------------------------
    out = out[:, :, :dhw]                              # drop spatial padding
    out = out.reshape(n, s, s, s, cout, d, h, w_sp)    # (n, kd, kh, kw, co, d, h, w)
    out = jnp.transpose(out, (0, 4, 5, 1, 6, 2, 7, 3)) # (n, co, d, kd, h, kh, w, kw)
    return out.reshape(n, cout, s * d, s * h, s * w_sp)


def upsampling_deconv_block_reference(x_ncdhw, w, b, *, stride=2):
    """Pure-JAX (XLA) reference: transposed conv as an lhs-dilated direct conv."""
    s = stride
    k = w.shape[-1]
    w_oi_flip = jnp.flip(jnp.transpose(w, (1, 0, 2, 3, 4)), axis=(2, 3, 4))
    y = lax.conv_general_dilated(
        x_ncdhw, w_oi_flip, window_strides=(1, 1, 1),
        padding=((k - 1, k - 1),) * 3, lhs_dilation=(s, s, s),
        dimension_numbers=("NCDHW", "OIDHW", "NCDHW"),
        precision=lax.Precision.HIGHEST)
    return jnp.maximum(y + b.reshape(1, -1, 1, 1, 1), 0.0)


if __name__ == "__main__":
    # UpsamplingDeconvBlock(n_filters_in=32, n_filters_out=16, stride=2,
    #                       normalization='none')
    n_filters_in, n_filters_out, stride = 32, 16, 2
    batch, depth, height, width = 2, 8, 8, 8

    key = jax.random.PRNGKey(0)
    kx, kw, kb = jax.random.split(key, 3)
    x = jax.random.normal(
        kx, (batch, n_filters_in, depth, height, width), jnp.float32)

    # Deterministic init at the PyTorch ConvTranspose3d default scale
    # (uniform +/- 1/sqrt(fan), fan = out_channels * kernel_volume).
    fan = n_filters_out * stride ** 3
    bound = 1.0 / float(fan) ** 0.5
    w = jax.random.uniform(
        kw, (n_filters_in, n_filters_out, stride, stride, stride),
        jnp.float32, -bound, bound)
    b = jax.random.uniform(kb, (n_filters_out,), jnp.float32, -bound, bound)

    ref = upsampling_deconv_block_reference(x, w, b, stride=stride)
    expected_shape = (batch, n_filters_out,
                      stride * depth, stride * height, stride * width)

    # Performance path: bf16 activations/weights/output, f32 accumulate+epilogue.
    fwd_bf16 = jax.jit(functools.partial(
        upsampling_deconv_block_forward, stride=stride,
        compute_dtype=jnp.bfloat16, out_dtype=jnp.bfloat16))
    out_bf16 = jax.block_until_ready(fwd_bf16(x, w, b))
    assert out_bf16.shape == expected_shape and out_bf16.dtype == jnp.bfloat16
    out_bf16_f32 = out_bf16.astype(jnp.float32)
    assert bool(jnp.allclose(out_bf16_f32, ref, rtol=2e-2, atol=2e-2)), \
        f"bf16 path max abs diff {float(jnp.max(jnp.abs(out_bf16_f32 - ref)))}"

    # Accuracy path: full f32 end-to-end (matches PyTorch f32 semantics).
    fwd_f32 = jax.jit(functools.partial(
        upsampling_deconv_block_forward, stride=stride,
        compute_dtype=jnp.float32, out_dtype=jnp.float32))
    out_f32 = jax.block_until_ready(fwd_f32(x, w, b))
    assert out_f32.shape == expected_shape and out_f32.dtype == jnp.float32
    assert bool(jnp.allclose(out_f32, ref, rtol=1e-4, atol=1e-4)), \
        f"f32 path max abs diff {float(jnp.max(jnp.abs(out_f32 - ref)))}"

    print("KERNEL_OK")
</pallas_src>

<mosaic_0001>
module attributes {stable_mosaic.version = 11 : i64} {
  func.func @_deconv_relu_kernel(%arg0: i32, %arg1: i32, %arg2: memref<1x32x512xbf16, #tpu.memory_space<vmem>>, %arg3: memref<128x32xbf16, #tpu.memory_space<vmem>>, %arg4: memref<128x1xf32, #tpu.memory_space<vmem>>, %arg5: memref<1x128x512xbf16, #tpu.memory_space<vmem>>) attributes {dimension_semantics = [#tpu.dimension_semantics<parallel>, #tpu.dimension_semantics<parallel>], iteration_bounds = array<i64: 2, 1>, scalar_prefetch = 0 : i64, scratch_operands = 0 : i64, tpu.core_type = #tpu.core_type<tc>, window_params = [{transform_indices = @transform_0, window_bounds = array<i64: 1, 32, 512>}, {pipeline_mode = #tpu.pipeline_mode<synchronous>, transform_indices = @transform_1, window_bounds = array<i64: 128, 32>}, {pipeline_mode = #tpu.pipeline_mode<synchronous>, transform_indices = @transform_2, window_bounds = array<i64: 128, 1>}, {transform_indices = @transform_3, window_bounds = array<i64: 1, 128, 512>}]} {
    %c0 = arith.constant 0 : index
    %c0_0 = arith.constant 0 : index
    %0 = vector.load %arg3[%c0, %c0_0] : memref<128x32xbf16, #tpu.memory_space<vmem>>, vector<128x32xbf16>
    %c0_1 = arith.constant 0 : index
    %c0_2 = arith.constant 0 : index
    %c0_3 = arith.constant 0 : index
    %1 = vector.load %arg2[%c0_1, %c0_2, %c0_3] : memref<1x32x512xbf16, #tpu.memory_space<vmem>>, vector<1x32x512xbf16>
    %2 = vector.shape_cast %1 : vector<1x32x512xbf16> to vector<32x512xbf16>
    %cst = arith.constant dense<0.000000e+00> : vector<128x512xf32>
    %3 = tpu.matmul %0, %2, %cst {dimension_numbers = #tpu.dot_dimension_numbers<[1], [0], [0], [1], [0, 0, 1, 1], [], []>} : vector<128x32xbf16>, vector<32x512xbf16>, vector<128x512xf32> -> vector<128x512xf32>
    %c0_4 = arith.constant 0 : index
    %c0_5 = arith.constant 0 : index
    %4 = vector.load %arg4[%c0_4, %c0_5] : memref<128x1xf32, #tpu.memory_space<vmem>>, vector<128x1xf32>
    %5 = vector.broadcast %4 : vector<128x1xf32> to vector<128x512xf32>
    %6 = arith.addf %3, %5 : vector<128x512xf32>
    %cst_6 = arith.constant 0.000000e+00 : f32
    %7 = vector.broadcast %cst_6 : f32 to vector<128x512xf32>
    %8 = arith.maximumf %6, %7 : vector<128x512xf32>
    %9 = arith.truncf %8 : vector<128x512xf32> to vector<128x512xbf16>
    %c0_7 = arith.constant 0 : index
    %c0_8 = arith.constant 0 : index
    %c0_9 = arith.constant 0 : index
    %10 = vector.load %arg5[%c0_7, %c0_8, %c0_9] : memref<1x128x512xbf16, #tpu.memory_space<vmem>>, vector<1x128x512xbf16>
    %11 = vector.shape_cast %10 : vector<1x128x512xbf16> to vector<128x512xbf16>
    %12 = vector.shape_cast %9 : vector<128x512xbf16> to vector<1x128x512xbf16>
    tpu.vector_store %arg5[%c0_7, %c0_8, %c0_9], %12 {strides = array<i32>} : memref<1x128x512xbf16, #tpu.memory_space<vmem>>, vector<1x128x512xbf16>,
    return
  }
  func.func @transform_0(%arg0: i32, %arg1: i32) -> (i32, i32, i32) {
    %c0_i32 = arith.constant 0 : i32
    %c0_i32_0 = arith.constant 0 : i32
    return %arg0, %c0_i32, %arg1 : i32, i32, i32
  }
  func.func @transform_1(%arg0: i32, %arg1: i32) -> (i32, i32) {
    %c0_i32 = arith.constant 0 : i32
    %c0_i32_0 = arith.constant 0 : i32
    %c0_i32_1 = arith.constant 0 : i32
    return %c0_i32, %c0_i32_0 : i32, i32
  }
  func.func @transform_2(%arg0: i32, %arg1: i32) -> (i32, i32) {
    %c0_i32 = arith.constant 0 : i32
    %c0_i32_0 = arith.constant 0 : i32
    %c0_i32_1 = arith.constant 0 : i32
    return %c0_i32, %c0_i32_0 : i32, i32
  }
  func.func @transform_3(%arg0: i32, %arg1: i32) -> (i32, i32, i32) {
    %c0_i32 = arith.constant 0 : i32
    %c0_i32_0 = arith.constant 0 : i32
    return %arg0, %c0_i32, %arg1 : i32, i32, i32
  }
}

</mosaic_0001>

<bundles_post_ra>
// kernel: tile.0
= control target key start
LH: loop header
LB: loop body
LE: loop exit
PB: predicated region body
PF: predicated region fallthrough
CT: control target
= control target key end

     0   :  { %vm3_vm0 = vcmask 7168   ;;  %s264_s8 = smov 125   ;;  %s265_s17 = smov 126   ;;  %s547_s0 = inlined_call_operand.vmem [shape: f32[8,16], index: 0, kind: input, shape index: {}]   ;;  %s548_s1 = inlined_call_operand.vmem [shape: f32[128,1], index: 1, kind: output, shape index: {}]  }
   0x1   :  { %v8_v0 = vld [vmem:[%s547_s0] sm:$0xff]   ;;  %s263_s0 = smov 127   ;;  %s266_s18 = smov 124  }
   0x2   :  { %9 = vrot.lane.b32.xlu0 %v8_v0, %s263_s0  ;;  %33 = vrot.lane.b32.xlu1 %v8_v0, %s264_s8  ;;  %4 = vst.msk [vmem:[%s548_s1] ss:$16 sm:$0x3] %vm3_vm0, %v8_v0   ;;  %5 = vst.msk [vmem:[%s548_s1] ss:$16 sm:$0xc] %vm3_vm0, %v8_v0  }
   0x3   :  { %6 = vst.msk [vmem:[%s548_s1] ss:$16 sm:$0x30] %vm3_vm0, %v8_v0   ;;  %7 = vst.msk [vmem:[%s548_s1] ss:$16 sm:$0xc0] %vm3_vm0, %v8_v0  }
   0x4   :  { %s267_s19 = smov 123   ;;  %s268_s20 = smov 122  }
   0x5   :  { %s269_s21 = smov 121   ;;  %s270_s22 = smov 120  }
   0x6   :  { %21 = vrot.lane.b32.xlu0 %v8_v0, %s265_s17  ;;  %45 = vrot.lane.b32.xlu1 %v8_v0, %s266_s18  ;;  %s271_s23 = smov 119   ;;  %s272_s24 = smov 118  }
   0x7   :  { %s273_s25 = smov 117   ;;  %s274_s26 = smov 116  }
   0x8   :  { %s275_s27 = smov 115   ;;  %s276_s28 = smov 114  }
   0x9   :  { %s277_s29 = smov 113  }
   0xa   :  { %57 = vrot.lane.b32.xlu0 %v8_v0, %s267_s19  ;;  %69 = vrot.lane.b32.xlu1 %v8_v0, %s268_s20 }
   0xe   :  { %81 = vrot.lane.b32.xlu0 %v8_v0, %s269_s21  ;;  %93 = vrot.lane.b32.xlu1 %v8_v0, %s270_s22 }
  0x12   :  { %105 = vrot.lane.b32.xlu0 %v8_v0, %s271_s23  ;;  %117 = vrot.lane.b32.xlu1 %v8_v0, %s272_s24 }
  0x16   :  { %129 = vrot.lane.b32.xlu0 %v8_v0, %s273_s25  ;;  %141 = vrot.lane.b32.xlu1 %v8_v0, %s274_s26 }
  0x1a   :  { %153 = vrot.lane.b32.xlu0 %v8_v0, %s275_s27  ;;  %165 = vrot.lane.b32.xlu1 %v8_v0, %s276_s28 }
  0x1e   :  { %177 = vrot.lane.b32.xlu0 %v8_v0, %s277_s29 }
  0x74   :  { %v10_v1 = vpop.permute.xlu0 %9   ;;  %v34_v2 = vpop.permute.xlu1 %33  }
  0x75   :  { %188 = vst.msk [vmem:[%s548_s1 + $0x1] ss:$16 sm:$0x3] %vm3_vm0, %v10_v1   ;;  %189 = vst.msk [vmem:[%s548_s1 + $0x1] ss:$16 sm:$0xc] %vm3_vm0, %v10_v1  }
  0x76   :  { %190 = vst.msk [vmem:[%s548_s1 + $0x1] ss:$16 sm:$0x30] %vm3_vm0, %v10_v1   ;;  %191 = vst.msk [vmem:[%s548_s1 + $0x1] ss:$16 sm:$0xc0] %vm3_vm0, %v10_v1  }
  0x77   :  { %196 = vst.msk [vmem:[%s548_s1 + $0x3] ss:$16 sm:$0x3] %vm3_vm0, %v34_v2   ;;  %197 = vst.msk [vmem:[%s548_s1 + $0x3] ss:$16 sm:$0xc] %vm3_vm0, %v34_v2  }
  0x78   :  { %198 = vst.msk [vmem:[%s548_s1 + $0x3] ss:$16 sm:$0x30] %vm3_vm0, %v34_v2   ;;  %199 = vst.msk [vmem:[%s548_s1 + $0x3] ss:$16 sm:$0xc0] %vm3_vm0, %v34_v2   ;;  %v22_v3 = vpop.permute.xlu0 %21   ;;  %v46_v4 = vpop.permute.xlu1 %45  }
  0x79   :  { %192 = vst.msk [vmem:[%s548_s1 + $0x2] ss:$16 sm:$0x3] %vm3_vm0, %v22_v3   ;;  %193 = vst.msk [vmem:[%s548_s1 + $0x2] ss:$16 sm:$0xc] %vm3_vm0, %v22_v3  }
  0x7a   :  { %194 = vst.msk [vmem:[%s548_s1 + $0x2] ss:$16 sm:$0x30] %vm3_vm0, %v22_v3   ;;  %195 = vst.msk [vmem:[%s548_s1 + $0x2] ss:$16 sm:$0xc0] %vm3_vm0, %v22_v3  }
  0x7b   :  { %200 = vst.msk [vmem:[%s548_s1 + $0x4] ss:$16 sm:$0x3] %vm3_vm0, %v46_v4   ;;  %201 = vst.msk [vmem:[%s548_s1 + $0x4] ss:$16 sm:$0xc] %vm3_vm0, %v46_v4  }
  0x7c   :  { %202 = vst.msk [vmem:[%s548_s1 + $0x4] ss:$16 sm:$0x30] %vm3_vm0, %v46_v4   ;;  %203 = vst.msk [vmem:[%s548_s1 + $0x4] ss:$16 sm:$0xc0] %vm3_vm0, %v46_v4   ;;  %v58_v5 = vpop.permute.xlu0 %57   ;;  %v70_v6 = vpop.permute.xlu1 %69  }
  0x7d   :  { %204 = vst.msk [vmem:[%s548_s1 + $0x5] ss:$16 sm:$0x3] %vm3_vm0, %v58_v5   ;;  %205 = vst.msk [vmem:[%s548_s1 + $0x5] ss:$16 sm:$0xc] %vm3_vm0, %v58_v5  }
  0x7e   :  { %206 = vst.msk [vmem:[%s548_s1 + $0x5] ss:$16 sm:$0x30] %vm3_vm0, %v58_v5   ;;  %207 = vst.msk [vmem:[%s548_s1 + $0x5] ss:$16 sm:$0xc0] %vm3_vm0, %v58_v5  }
  0x7f   :  { %208 = vst.msk [vmem:[%s548_s1 + $0x6] ss:$16 sm:$0x3] %vm3_vm0, %v70_v6   ;;  %209 = vst.msk [vmem:[%s548_s1 + $0x6] ss:$16 sm:$0xc] %vm3_vm0, %v70_v6  }
  0x80   :  { %210 = vst.msk [vmem:[%s548_s1 + $0x6] ss:$16 sm:$0x30] %vm3_vm0, %v70_v6   ;;  %211 = vst.msk [vmem:[%s548_s1 + $0x6] ss:$16 sm:$0xc0] %vm3_vm0, %v70_v6   ;;  %v82_v7 = vpop.permute.xlu0 %81   ;;  %v94_v8 = vpop.permute.xlu1 %93  }
  0x81   :  { %212 = vst.msk [vmem:[%s548_s1 + $0x7] ss:$16 sm:$0x3] %vm3_vm0, %v82_v7   ;;  %213 = vst.msk [vmem:[%s548_s1 + $0x7] ss:$16 sm:$0xc] %vm3_vm0, %v82_v7  }
  0x82   :  { %214 = vst.msk [vmem:[%s548_s1 + $0x7] ss:$16 sm:$0x30] %vm3_vm0, %v82_v7   ;;  %215 = vst.msk [vmem:[%s548_s1 + $0x7] ss:$16 sm:$0xc0] %vm3_vm0, %v82_v7  }
  0x83   :  { %216 = vst.msk [vmem:[%s548_s1 + $0x8] ss:$16 sm:$0x3] %vm3_vm0, %v94_v8   ;;  %217 = vst.msk [vmem:[%s548_s1 + $0x8] ss:$16 sm:$0xc] %vm3_vm0, %v94_v8  }
  0x84   :  { %218 = vst.msk [vmem:[%s548_s1 + $0x8] ss:$16 sm:$0x30] %vm3_vm0, %v94_v8   ;;  %219 = vst.msk [vmem:[%s548_s1 + $0x8] ss:$16 sm:$0xc0] %vm3_vm0, %v94_v8   ;;  %v106_v9 = vpop.permute.xlu0 %105   ;;  %v118_v10 = vpop.permute.xlu1 %117  }
  0x85   :  { %220 = vst.msk [vmem:[%s548_s1 + $0x9] ss:$16 sm:$0x3] %vm3_vm0, %v106_v9   ;;  %221 = vst.msk [vmem:[%s548_s1 + $0x9] ss:$16 sm:$0xc] %vm3_vm0, %v106_v9  }
  0x86   :  { %222 = vst.msk [vmem:[%s548_s1 + $0x9] ss:$16 sm:$0x30] %vm3_vm0, %v106_v9   ;;  %223 = vst.msk [vmem:[%s548_s1 + $0x9] ss:$16 sm:$0xc0] %vm3_vm0, %v106_v9  }
  0x87   :  { %224 = vst.msk [vmem:[%s548_s1 + $0xa] ss:$16 sm:$0x3] %vm3_vm0, %v118_v10   ;;  %225 = vst.msk [vmem:[%s548_s1 + $0xa] ss:$16 sm:$0xc] %vm3_vm0, %v118_v10  }
  0x88   :  { %226 = vst.msk [vmem:[%s548_s1 + $0xa] ss:$16 sm:$0x30] %vm3_vm0, %v118_v10   ;;  %227 = vst.msk [vmem:[%s548_s1 + $0xa] ss:$16 sm:$0xc0] %vm3_vm0, %v118_v10   ;;  %v130_v11 = vpop.permute.xlu0 %129   ;;  %v142_v12 = vpop.permute.xlu1 %141  }
  0x89   :  { %228 = vst.msk [vmem:[%s548_s1 + $0xb] ss:$16 sm:$0x3] %vm3_vm0, %v130_v11   ;;  %229 = vst.msk [vmem:[%s548_s1 + $0xb] ss:$16 sm:$0xc] %vm3_vm0, %v130_v11  }
  0x8a   :  { %230 = vst.msk [vmem:[%s548_s1 + $0xb] ss:$16 sm:$0x30] %vm3_vm0, %v130_v11   ;;  %231 = vst.msk [vmem:[%s548_s1 + $0xb] ss:$16 sm:$0xc0] %vm3_vm0, %v130_v11  }
  0x8b   :  { %232 = vst.msk [vmem:[%s548_s1 + $0xc] ss:$16 sm:$0x3] %vm3_vm0, %v142_v12   ;;  %233 = vst.msk [vmem:[%s548_s1 + $0xc] ss:$16 sm:$0xc] %vm3_vm0, %v142_v12  }
  0x8c   :  { %234 = vst.msk [vmem:[%s548_s1 + $0xc] ss:$16 sm:$0x30] %vm3_vm0, %v142_v12   ;;  %235 = vst.msk [vmem:[%s548_s1 + $0xc] ss:$16 sm:$0xc0] %vm3_vm0, %v142_v12   ;;  %v154_v13 = vpop.permute.xlu0 %153   ;;  %v166_v14 = vpop.permute.xlu1 %165  }
  0x8d   :  { %236 = vst.msk [vmem:[%s548_s1 + $0xd] ss:$16 sm:$0x3] %vm3_vm0, %v154_v13   ;;  %237 = vst.msk [vmem:[%s548_s1 + $0xd] ss:$16 sm:$0xc] %vm3_vm0, %v154_v13  }
  0x8e   :  { %238 = vst.msk [vmem:[%s548_s1 + $0xd] ss:$16 sm:$0x30] %vm3_vm0, %v154_v13   ;;  %239 = vst.msk [vmem:[%s548_s1 + $0xd] ss:$16 sm:$0xc0] %vm3_vm0, %v154_v13  }
  0x8f   :  { %240 = vst.msk [vmem:[%s548_s1 + $0xe] ss:$16 sm:$0x3] %vm3_vm0, %v166_v14   ;;  %241 = vst.msk [vmem:[%s548_s1 + $0xe] ss:$16 sm:$0xc] %vm3_vm0, %v166_v14  }
  0x90   :  { %242 = vst.msk [vmem:[%s548_s1 + $0xe] ss:$16 sm:$0x30] %vm3_vm0, %v166_v14   ;;  %243 = vst.msk [vmem:[%s548_s1 + $0xe] ss:$16 sm:$0xc0] %vm3_vm0, %v166_v14   ;;  %v178_v15 = vpop.permute.xlu0 %177  }
  0x91   :  { %244 = vst.msk [vmem:[%s548_s1 + $0xf] ss:$16 sm:$0x3] %vm3_vm0, %v178_v15   ;;  %245 = vst.msk [vmem:[%s548_s1 + $0xf] ss:$16 sm:$0xc] %vm3_vm0, %v178_v15  }
  0x92   :  { %246 = vst.msk [vmem:[%s548_s1 + $0xf] ss:$16 sm:$0x30] %vm3_vm0, %v178_v15   ;;  %247 = vst.msk [vmem:[%s548_s1 + $0xf] ss:$16 sm:$0xc0] %vm3_vm0, %v178_v15  }

// kernel: tile.8
= control target key start
LH: loop header
LB: loop body
LE: loop exit
PB: predicated region body
PF: predicated region fallthrough
CT: control target
= control target key end

     0   :  { %2 = vsyncpa [#allocation1], 0  ;;  %s44_s6 = smov [#allocation0]   ;;  %s70_s0 = inlined_call_operand.hbm [shape: f32[16], index: 0, kind: input, shape index: {}]   ;;  %s71_s1 = inlined_call_operand.vmem [shape: f32[8,16], index: 1, kind: output, shape index: {}]  }
   0x1   :  { %s9_s7 = sshll.u32 %s44_s6, 4  ;;  %s20_s10 = scalar_lea.hbm %s70_s0, 16  ;;  %s10_s7 = int_to_ptr.vmem [resolvable:$true] %s9_s7 }
   0x2   :  { %p21_p0 = scmp.ne.s32.totalorder %s70_s0, %s20_s10  ;;  %p24_p1 = scmp.lt.u32.totalorder %s20_s10, %s70_s0 }
   0x4   :  { %p26_p2 = pnand %p24_p1, %p21_p0 }
   0x6   :  { %29 = shalt.err (!%p26_p2)
}
   0x7   :  { %s30_s15 = scalar_lea.vmem %s10_s7, 16  ;;  %s34_s16 = scalar_lea.vmem %s10_s7, 32 }
   0x8   :  { %p31_p3 = scmp.ne.s32.totalorder %s10_s7, %s30_s15  ;;  %p35_p4 = scmp.lt.s32.totalorder %s10_s7, %s10_s7 }
   0x9   :  { %p36_p5 = scmp.lt.s32.totalorder %s34_s16, %s30_s15 }
   0xb   :  { %p37_p6 = por %p36_p5, %p35_p4 }
   0xd   :  { %p38_p7 = pnand %p37_p6, %p31_p3 }
   0xf   :  { %41 = shalt.err (!%p38_p7)
}
  0x10   :  { %12 = dma.hbm_to_vmem [thread:$0]  %s70_s0, 16, %s10_s7, [#allocation1]  }
  0x11   :  { %42 = dma.done.wait [#allocation1], 16  }
  0x12   :  { %43 = vsyncadd [#allocation1], 4294967280  ;;  %v16_v0 = vld [vmem:[#allocation0] ss:$0 sm:$0xff] }
  0x13   :  { %17 = vst [vmem:[%s71_s1] sm:$0xff] %v16_v0 }
  0x14   :  { %18 = vsyncpa [#allocation1], 1 }

// kernel: upsampling_deconv_block_forward.1
= control target key start
LH: loop header
LB: loop body
LE: loop exit
PB: predicated region body
PF: predicated region fallthrough
CT: control target
= control target key end

     0   :  { %s1238_s12 = smov 0   ;;  %s1240_s13 = smov 0   ;;  %s1415_s0 = inlined_call_operand.vmem [shape: bf16[2,32,512], index: 0, kind: input, shape index: {}]   ;;  %s1416_s1 = inlined_call_operand.vmem [shape: bf16[128,32], index: 1, kind: input, shape index: {}]   ;;  %s1417_s2 = inlined_call_operand.vmem [shape: f32[128,1], index: 2, kind: input, shape index: {}]   ;;  %s1418_s3 = inlined_call_operand.vmem [shape: bf16[2,128,512], index: 3, kind: output, shape index: {}]  }
   0x1   :  { %s1242_s14 = smov 0  }
   0x2 LB: > { %s25_s15 = sadd.s32 1, %s1211_s13  ;;  %p1041_p0 = scmp.ge.s32.totalorder %s1215_s14, 1  ;;  %s1215_s14 = sphi %s1242_s14, %s13_s14   ;;  %s1211_s13 = sphi %s1240_s13, %s1420_s13   ;;  %s1207_s12 = sphi %s1238_s12, %s1419_s12  }
   0x3   : > { %p27_p1 = scmp.ge.s32.totalorder %s25_s15, 2  ;;  %p158_p2 = scmp.lt.s32.totalorder %s1215_s14, 3 }
   0x5   : > { %s1422_s15 = smov (%p27_p1, %s25_s15), 0  ;;  %p159_p3 = pnand %p1041_p0, %p158_p2 }
   0x6   : > { %p191_p4 = scmp.lt.s32.totalorder (!%p159_p3), %s1207_s12, 1  ;;  %v1217_v0 = vmov (!%p159_p3), 0   ;;  %v1185_v9 = vld [vmem:[%s1416_s1] sm:$0xff] (!%p159_p3)   ;;  %vm411_vm0 = vcmask (!%p159_p3), 261120   ;;  %v237_v11 = vld [vmem:[%s1417_s2 + $0x10] sm:$0xff] (!%p159_p3)  ;;  %v236_v12 = vld [vmem:[%s1417_s2 + $0x8] sm:$0xff] (!%p159_p3) }
   0x7   : > { %162 = sbr.rel (%p159_p3) target bundleno = 304 (0x130), region = 32  ;;  %468 = vmatprep.mubr.bf16.mxu0 (!%p159_p3), %v1217_v0  ;;  %581 = vmatprep.mubr.bf16.mxu1 (!%p159_p3), %v1217_v0  ;;  %v235_v10 = vld [vmem:[%s1417_s2] sm:$0xff] (!%p159_p3)  ;;  %v238_v13 = vld [vmem:[%s1417_s2 + $0x18] sm:$0xff] (!%p159_p3)  ;;  %v240_v14 = vld [vmem:[%s1417_s2 + $0x28] sm:$0xff] (!%p159_p3) }
   0x8   : > { %1171 = vset.pattern.permute.xlu0 (!%p159_p3), %v1217_v0  ;;  %1172 = vset.pattern.permute.xlu1 (!%p159_p3), %v1217_v0  ;;  %v239_v15 = vld [vmem:[%s1417_s2 + $0x20] sm:$0xff] (!%p159_p3)  ;;  %v1186_v16 = vld [vmem:[%s1416_s1 + $0x8] sm:$0xff] (!%p159_p3)   ;;  %v242_v17 = vld [vmem:[%s1417_s2 + $0x38] sm:$0xff] (!%p159_p3) }
   0x9   : > { %253 = vperm.xlu0 (!%p159_p3), %1171, %v235_v10   ;;  %263 = vperm.xlu1 (!%p159_p3), %1172, %v237_v11   ;;  %v241_v18 = vld [vmem:[%s1417_s2 + $0x30] sm:$0xff] (!%p159_p3)  ;;  %v244_v19 = vld [vmem:[%s1417_s2 + $0x48] sm:$0xff] (!%p159_p3)  ;;  %v243_v20 = vld [vmem:[%s1417_s2 + $0x40] sm:$0xff] (!%p159_p3) }
   0xa   : > { %v1187_v21 = vld [vmem:[%s1416_s1 + $0x10] sm:$0xff] (!%p159_p3)   ;;  %v246_v22 = vld [vmem:[%s1417_s2 + $0x58] sm:$0xff] (!%p159_p3)  ;;  %v248_v24 = vld [vmem:[%s1417_s2 + $0x68] sm:$0xff] (!%p159_p3) }
   0xb   : > { %v245_v23 = vld [vmem:[%s1417_s2 + $0x50] sm:$0xff] (!%p159_p3)  ;;  %v247_v25 = vld [vmem:[%s1417_s2 + $0x60] sm:$0xff] (!%p159_p3)  ;;  %v1188_v26 = vld [vmem:[%s1416_s1 + $0x18] sm:$0xff] (!%p159_p3)  }
   0xc   : > { %v250_v27 = vld [vmem:[%s1417_s2 + $0x78] sm:$0xff] (!%p159_p3)  ;;  %v249_v28 = vld [vmem:[%s1417_s2 + $0x70] sm:$0xff] (!%p159_p3)  ;;  %v1189_v29 = vld [vmem:[%s1416_s1 + $0x20] sm:$0xff] (!%p159_p3)  }
   0xd   : > { %258 = vperm.xlu0 (!%p159_p3), %1171, %v236_v12   ;;  %268 = vperm.xlu1 (!%p159_p3), %1172, %v238_v13   ;;  %v1190_v30 = vld [vmem:[%s1416_s1 + $0x28] sm:$0xff] (!%p159_p3)   ;;  %v1191_v31 = vld [vmem:[%s1416_s1 + $0x30] sm:$0xff] (!%p159_p3)   ;;  %v1192_v32 = vld [vmem:[%s1416_s1 + $0x38] sm:$0xff] (!%p159_p3)  }
   0xe   : > { %s1424_s12 = smov (!%p191_p4, %s1207_s12), 1 }
   0xf   : > { %s1112_s16 = sshll.u32 %s1424_s12, 6  ;;  %s1113_s22 = sshll.u32 %s1424_s12, 8 }
  0x10   : > { %s198_s19 = scalar_lea.vmem %s1415_s0, %s1112_s16  ;;  %s1372_s25 = scalar_lea.vmem %s1418_s3, %s1113_s22 }
  0x11   : > { %v1173_v1 = vld [vmem:[%s198_s19 + $0x4] ss:$16 sps:$4 sm:$0xff]   ;;  %v1175_v2 = vld [vmem:[%s198_s19 + $0xc] ss:$16 sps:$4 sm:$0xff]   ;;  %v1177_v3 = vld [vmem:[%s198_s19] ss:$16 sps:$4 sm:$0xff]   ;;  %278 = vperm.xlu1 %1172, %v240_v14   ;;  %273 = vperm.xlu0 %1171, %v239_v15  }
  0x12   : > { %436 = vmatprep.subr.bf16.mxu0 %v1173_v1  ;;  %v1178_v4 = vld [vmem:[%s198_s19 + $0x8] ss:$16 sps:$4 sm:$0xff]   ;;  %549 = vmatprep.subr.bf16.mxu1 %v1175_v2  ;;  %v1179_v5 = vld [vmem:[%s198_s19 + $0x24] ss:$16 sps:$4 sm:$0xff]   ;;  %v1181_v6 = vld [vmem:[%s198_s19 + $0x2c] ss:$16 sps:$4 sm:$0xff]  }
  0x13   : > { %437 = vmatpush1.bf16.msra.mxu0 %v1177_v3  ;;  %550 = vmatpush1.bf16.msra.mxu1 %v1178_v4  ;;  %v1183_v7 = vld [vmem:[%s198_s19 + $0x20] ss:$16 sps:$4 sm:$0xff]   ;;  %v1184_v8 = vld [vmem:[%s198_s19 + $0x28] ss:$16 sps:$4 sm:$0xff]  }
  0x14   : > { %438 = vmatprep.subr.bf16.mxu0 %v1179_v5  ;;  %551 = vmatprep.subr.bf16.mxu1 %v1181_v6 }
  0x15   : > { %288 = vperm.xlu1 %1172, %v242_v17   ;;  %283 = vperm.xlu0 %1171, %v241_v18  }
  0x17   : > { %439 = vmatpush1.bf16.msra.mxu0 %v1183_v7  ;;  %552 = vmatpush1.bf16.msra.mxu1 %v1184_v8 }
  0x19   : > { %298 = vperm.xlu1 %1172, %v244_v19   ;;  %293 = vperm.xlu0 %1171, %v243_v20  }
  0x1a   : > { %1062 = vmatmul.mubr.msk.bf16.vlgmr.msra.gmra.mrb[0].mxu0 %vm411_vm0, %v1185_v9  ;;  %1070 = vmatmul.mubr.msk.bf16.vlgmr.msra.gmra.mrb[0].mxu1 %vm411_vm0, %v1185_v9 }
  0x1b   : > { %478 = vmatprep.mubr.bf16.mxu0 %v1217_v0  ;;  %591 = vmatprep.mubr.bf16.mxu1 %v1217_v0 }
  0x1d   : > { %308 = vperm.xlu1 %1172, %v246_v22   ;;  %303 = vperm.xlu0 %1171, %v245_v23  }
  0x21   : > { %318 = vperm.xlu1 %1172, %v248_v24   ;;  %313 = vperm.xlu0 %1171, %v247_v25  }
  0x22   : > { %1063 = vmatmul.mubr.msk.bf16.gmra.mrb[4].mxu0 %vm411_vm0, %v1186_v16  ;;  %1071 = vmatmul.mubr.msk.bf16.gmra.mrb[4].mxu1 %vm411_vm0, %v1186_v16 }
  0x23   : > { %488 = vmatprep.mubr.bf16.mxu0 %v1217_v0  ;;  %601 = vmatprep.mubr.bf16.mxu1 %v1217_v0 }
  0x25   : > { %328 = vperm.xlu1 %1172, %v250_v27   ;;  %323 = vperm.xlu0 %1171, %v249_v28  }
  0x2a   : > { %1064 = vmatmul.mubr.msk.bf16.gmra.mrb[8].mxu0 %vm411_vm0, %v1187_v21  ;;  %1072 = vmatmul.mubr.msk.bf16.gmra.mrb[8].mxu1 %vm411_vm0, %v1187_v21 }
  0x2b   : > { %498 = vmatprep.mubr.bf16.mxu0 %v1217_v0  ;;  %611 = vmatprep.mubr.bf16.mxu1 %v1217_v0 }
  0x32   : > { %1065 = vmatmul.mubr.msk.bf16.gmra.mrb[12].mxu0 %vm411_vm0, %v1188_v26  ;;  %1073 = vmatmul.mubr.msk.bf16.gmra.mrb[12].mxu1 %vm411_vm0, %v1188_v26 }
  0x33   : > { %508 = vmatprep.mubr.bf16.mxu0 %v1217_v0  ;;  %621 = vmatprep.mubr.bf16.mxu1 %v1217_v0 }
  0x3a   : > { %1066 = vmatmul.mubr.msk.bf16.gmra.mrb[16].mxu0 %vm411_vm0, %v1189_v29  ;;  %1074 = vmatmul.mubr.msk.bf16.gmra.mrb[16].mxu1 %vm411_vm0, %v1189_v29 }
  0x3b   : > { %518 = vmatprep.mubr.bf16.mxu0 %v1217_v0  ;;  %631 = vmatprep.mubr.bf16.mxu1 %v1217_v0 }
  0x42   : > { %1067 = vmatmul.mubr.msk.bf16.gmra.mrb[20].mxu0 %vm411_vm0, %v1190_v30  ;;  %1075 = vmatmul.mubr.msk.bf16.gmra.mrb[20].mxu1 %vm411_vm0, %v1190_v30 }
  0x43   : > { %528 = vmatprep.mubr.bf16.mxu0 %v1217_v0  ;;  %641 = vmatprep.mubr.bf16.mxu1 %v1217_v0 }
  0x4a   : > { %1068 = vmatmul.mubr.msk.bf16.gmra.mrb[24].mxu0 %vm411_vm0, %v1191_v31  ;;  %1076 = vmatmul.mubr.msk.bf16.gmra.mrb[24].mxu1 %vm411_vm0, %v1191_v31 }
  0x4b   : > { %538 = vmatprep.mubr.bf16.mxu0 %v1217_v0  ;;  %651 = vmatprep.mubr.bf16.mxu1 %v1217_v0 }
  0x52   : > { %1069 = vmatmul.mubr.msk.bf16.gmra.mrb[28].mxu0 %vm411_vm0, %v1192_v32  ;;  %1077 = vmatmul.mubr.msk.bf16.gmra.mrb[28].mxu1 %vm411_vm0, %v1192_v32 }
  0x88   : > { %v254_v33 = vpop.permute.xlu0 %253  ;;  %v264_v35 = vpop.permute.xlu1 %263 }
  0x8c   : > { %v259_v34 = vpop.permute.xlu0 %258  ;;  %v269_v62 = vpop.permute.xlu1 %268 }
  0x90   : > { %v279_v27 = vpop.permute.xlu1 %278  ;;  %v274_v28 = vpop.permute.xlu0 %273 }
  0xed   : > { %v470_v36 = vpop.f32.mrb[0].mxu0  ;;  %v583_v37 = vpop.f32.mrb[0].mxu1 }
  0xee   : > { %v471_v38 = vadd.f32 %v470_v36, %v254_v33  ;;  %v584_v39 = vadd.f32 %v583_v37, %v254_v33  ;;  %v472_v40 = vpop.f32.mrb[1].mxu0  ;;  %v585_v41 = vpop.f32.mrb[1].mxu1 }
  0xef   : > { %v473_v42 = vadd.f32 %v472_v40, %v254_v33  ;;  %v586_v43 = vadd.f32 %v585_v41, %v254_v33  ;;  %v474_v44 = vpop.f32.mrb[2].mxu0  ;;  %v587_v45 = vpop.f32.mrb[2].mxu1 }
  0xf0   : > { %v662_v46 = vmax.f32 %v471_v38, 0.0  ;;  %v664_v47 = vmax.f32 %v584_v39, 0.0  ;;  %v475_v48 = vadd.f32 %v474_v44, %v259_v34  ;;  %v588_v49 = vadd.f32 %v587_v45, %v259_v34  ;;  %v476_v50 = vpop.f32.mrb[3].mxu0  ;;  %v589_v51 = vpop.f32.mrb[3].mxu1 }
  0xf1   : > { %v663_v52 = vmax.f32 %v473_v42, 0.0  ;;  %v665_v53 = vmax.f32 %v586_v43, 0.0  ;;  %v477_v54 = vadd.f32 %v476_v50, %v259_v34  ;;  %v590_v55 = vadd.f32 %v589_v51, %v259_v34 }
  0xf2   : > { %v666_v56 = vmax.f32 %v475_v48, 0.0  ;;  %v668_v57 = vmax.f32 %v588_v49, 0.0 }
  0xf3   : > { %v1114_v58 = vpack.c.bf16 %v663_v52, %v662_v46  ;;  %v1115_v59 = vpack.c.bf16 %v665_v53, %v664_v47  ;;  %v667_v60 = vmax.f32 %v477_v54, 0.0  ;;  %v669_v61 = vmax.f32 %v590_v55, 0.0 }
  0xf5   : > { %918 = vst [vmem:[%s1372_s25] sm:$0xff] %v1114_v58  ;;  %919 = vst [vmem:[%s1372_s25 + $0x8] sm:$0xff] %v1115_v59  ;;  %v1116_v63 = vpack.c.bf16 %v667_v60, %v666_v56  ;;  %v1117_v0 = vpack.c.bf16 %v669_v61, %v668_v57  ;;  %v480_v1 = vpop.f32.mrb[4].mxu0  ;;  %v593_v2 = vpop.f32.mrb[4].mxu1 }
  0xf6   : > { %v481_v3 = vadd.f32 %v480_v1, %v264_v35  ;;  %v594_v4 = vadd.f32 %v593_v2, %v264_v35  ;;  %v482_v5 = vpop.f32.mrb[5].mxu0  ;;  %v595_v6 = vpop.f32.mrb[5].mxu1 }
  0xf7   : > { %920 = vst [vmem:[%s1372_s25 + $0x10] sm:$0xff] %v1116_v63  ;;  %921 = vst [vmem:[%s1372_s25 + $0x18] sm:$0xff] %v1117_v0  ;;  %v483_v7 = vadd.f32 %v482_v5, %v264_v35  ;;  %v596_v8 = vadd.f32 %v595_v6, %v264_v35  ;;  %v484_v9 = vpop.f32.mrb[6].mxu0  ;;  %v597_v10 = vpop.f32.mrb[6].mxu1 }
  0xf8   : > { %v670_v11 = vmax.f32 %v481_v3, 0.0  ;;  %v672_v12 = vmax.f32 %v594_v4, 0.0  ;;  %v485_v13 = vadd.f32 %v484_v9, %v269_v62  ;;  %v598_v14 = vadd.f32 %v597_v10, %v269_v62  ;;  %v486_v15 = vpop.f32.mrb[7].mxu0  ;;  %v599_v16 = vpop.f32.mrb[7].mxu1 }
  0xf9   : > { %v671_v17 = vmax.f32 %v483_v7, 0.0  ;;  %v673_v18 = vmax.f32 %v596_v8, 0.0  ;;  %v487_v19 = vadd.f32 %v486_v15, %v269_v62  ;;  %v600_v20 = vadd.f32 %v599_v16, %v269_v62  ;;  %v289_v57 = vpop.permute.xlu1 %288  ;;  %v284_v58 = vpop.permute.xlu0 %283 }
  0xfa   : > { %v674_v21 = vmax.f32 %v485_v13, 0.0  ;;  %v676_v22 = vmax.f32 %v598_v14, 0.0 }
  0xfb   : > { %v1118_v23 = vpack.c.bf16 %v671_v17, %v670_v11  ;;  %v1119_v24 = vpack.c.bf16 %v673_v18, %v672_v12  ;;  %v675_v25 = vmax.f32 %v487_v19, 0.0  ;;  %v677_v26 = vmax.f32 %v600_v20, 0.0 }
  0xfd   : > { %922 = vst [vmem:[%s1372_s25 + $0x20] sm:$0xff] %v1118_v23  ;;  %923 = vst [vmem:[%s1372_s25 + $0x28] sm:$0xff] %v1119_v24  ;;  %v1120_v29 = vpack.c.bf16 %v675_v25, %v674_v21  ;;  %v1121_v30 = vpack.c.bf16 %v677_v26, %v676_v22  ;;  %v490_v31 = vpop.f32.mrb[8].mxu0  ;;  %v603_v32 = vpop.f32.mrb[8].mxu1 }
  0xfe   : > { %v491_v33 = vadd.f32 %v490_v31, %v274_v28  ;;  %v604_v34 = vadd.f32 %v603_v32, %v274_v28  ;;  %v492_v35 = vpop.f32.mrb[9].mxu0  ;;  %v605_v36 = vpop.f32.mrb[9].mxu1 }
  0xff   : > { %924 = vst [vmem:[%s1372_s25 + $0x30] sm:$0xff] %v1120_v29  ;;  %925 = vst [vmem:[%s1372_s25 + $0x38] sm:$0xff] %v1121_v30  ;;  %v493_v37 = vadd.f32 %v492_v35, %v274_v28  ;;  %v606_v38 = vadd.f32 %v605_v36, %v274_v28  ;;  %v494_v39 = vpop.f32.mrb[10].mxu0  ;;  %v607_v40 = vpop.f32.mrb[10].mxu1 }
 0x100   : > { %v678_v41 = vmax.f32 %v491_v33, 0.0  ;;  %v680_v42 = vmax.f32 %v604_v34, 0.0  ;;  %v495_v43 = vadd.f32 %v494_v39, %v279_v27  ;;  %v608_v44 = vadd.f32 %v607_v40, %v279_v27  ;;  %v496_v45 = vpop.f32.mrb[11].mxu0  ;;  %v609_v46 = vpop.f32.mrb[11].mxu1 }
 0x101   : > { %v679_v47 = vmax.f32 %v493_v37, 0.0  ;;  %v681_v48 = vmax.f32 %v606_v38, 0.0  ;;  %v497_v49 = vadd.f32 %v496_v45, %v279_v27  ;;  %v610_v50 = vadd.f32 %v609_v46, %v279_v27  ;;  %v299_v23 = vpop.permute.xlu1 %298  ;;  %v294_v24 = vpop.permute.xlu0 %293 }
 0x102   : > { %v682_v51 = vmax.f32 %v495_v43, 0.0  ;;  %v684_v52 = vmax.f32 %v608_v44, 0.0 }
 0x103   : > { %v1122_v53 = vpack.c.bf16 %v679_v47, %v678_v41  ;;  %v1123_v54 = vpack.c.bf16 %v681_v48, %v680_v42  ;;  %v683_v55 = vmax.f32 %v497_v49, 0.0  ;;  %v685_v56 = vmax.f32 %v610_v50, 0.0 }
 0x105   : > { %926 = vst [vmem:[%s1372_s25 + $0x40] sm:$0xff] %v1122_v53  ;;  %927 = vst [vmem:[%s1372_s25 + $0x48] sm:$0xff] %v1123_v54  ;;  %v1124_v59 = vpack.c.bf16 %v683_v55, %v682_v51  ;;  %v1125_v60 = vpack.c.bf16 %v685_v56, %v684_v52  ;;  %v500_v61 = vpop.f32.mrb[12].mxu0  ;;  %v613_v62 = vpop.f32.mrb[12].mxu1 }
 0x106   : > { %v501_v63 = vadd.f32 %v500_v61, %v284_v58  ;;  %v614_v0 = vadd.f32 %v613_v62, %v284_v58  ;;  %v502_v1 = vpop.f32.mrb[13].mxu0  ;;  %v615_v2 = vpop.f32.mrb[13].mxu1 }
 0x107   : > { %928 = vst [vmem:[%s1372_s25 + $0x50] sm:$0xff] %v1124_v59  ;;  %929 = vst [vmem:[%s1372_s25 + $0x58] sm:$0xff] %v1125_v60  ;;  %v503_v3 = vadd.f32 %v502_v1, %v284_v58  ;;  %v616_v4 = vadd.f32 %v615_v2, %v284_v58  ;;  %v504_v5 = vpop.f32.mrb[14].mxu0  ;;  %v617_v6 = vpop.f32.mrb[14].mxu1 }
 0x108   : > { %v686_v7 = vmax.f32 %v501_v63, 0.0  ;;  %v688_v8 = vmax.f32 %v614_v0, 0.0  ;;  %v505_v9 = vadd.f32 %v504_v5, %v289_v57  ;;  %v618_v10 = vadd.f32 %v617_v6, %v289_v57  ;;  %v506_v11 = vpop.f32.mrb[15].mxu0  ;;  %v619_v12 = vpop.f32.mrb[15].mxu1 }
 0x109   : > { %v687_v13 = vmax.f32 %v503_v3, 0.0  ;;  %v689_v14 = vmax.f32 %v616_v4, 0.0  ;;  %v507_v15 = vadd.f32 %v506_v11, %v289_v57  ;;  %v620_v16 = vadd.f32 %v619_v12, %v289_v57  ;;  %v309_v53 = vpop.permute.xlu1 %308  ;;  %v304_v54 = vpop.permute.xlu0 %303 }
 0x10a   : > { %v690_v17 = vmax.f32 %v505_v9, 0.0  ;;  %v692_v18 = vmax.f32 %v618_v10, 0.0 }
 0x10b   : > { %v1126_v19 = vpack.c.bf16 %v687_v13, %v686_v7  ;;  %v1127_v20 = vpack.c.bf16 %v689_v14, %v688_v8  ;;  %v691_v21 = vmax.f32 %v507_v15, 0.0  ;;  %v693_v22 = vmax.f32 %v620_v16, 0.0 }
 0x10d   : > { %930 = vst [vmem:[%s1372_s25 + $0x60] sm:$0xff] %v1126_v19  ;;  %931 = vst [vmem:[%s1372_s25 + $0x68] sm:$0xff] %v1127_v20  ;;  %v1128_v25 = vpack.c.bf16 %v691_v21, %v690_v17  ;;  %v1129_v26 = vpack.c.bf16 %v693_v22, %v692_v18  ;;  %v510_v27 = vpop.f32.mrb[16].mxu0  ;;  %v623_v28 = vpop.f32.mrb[16].mxu1 }
 0x10e   : > { %v511_v29 = vadd.f32 %v510_v27, %v294_v24  ;;  %v624_v30 = vadd.f32 %v623_v28, %v294_v24  ;;  %v512_v31 = vpop.f32.mrb[17].mxu0  ;;  %v625_v32 = vpop.f32.mrb[17].mxu1 }
 0x10f   : > { %932 = vst [vmem:[%s1372_s25 + $0x70] sm:$0xff] %v1128_v25  ;;  %933 = vst [vmem:[%s1372_s25 + $0x78] sm:$0xff] %v1129_v26  ;;  %v513_v33 = vadd.f32 %v512_v31, %v294_v24  ;;  %v626_v34 = vadd.f32 %v625_v32, %v294_v24  ;;  %v514_v35 = vpop.f32.mrb[18].mxu0  ;;  %v627_v36 = vpop.f32.mrb[18].mxu1 }
 0x110   : > { %v694_v37 = vmax.f32 %v511_v29, 0.0  ;;  %v696_v38 = vmax.f32 %v624_v30, 0.0  ;;  %v515_v39 = vadd.f32 %v514_v35, %v299_v23  ;;  %v628_v40 = vadd.f32 %v627_v36, %v299_v23  ;;  %v516_v41 = vpop.f32.mrb[19].mxu0  ;;  %v629_v42 = vpop.f32.mrb[19].mxu1 }
 0x111   : > { %v695_v43 = vmax.f32 %v513_v33, 0.0  ;;  %v697_v44 = vmax.f32 %v626_v34, 0.0  ;;  %v517_v45 = vadd.f32 %v516_v41, %v299_v23  ;;  %v630_v46 = vadd.f32 %v629_v42, %v299_v23  ;;  %v319_v19 = vpop.permute.xlu1 %318  ;;  %v314_v20 = vpop.permute.xlu0 %313 }
 0x112   : > { %v698_v47 = vmax.f32 %v515_v39, 0.0  ;;  %v700_v48 = vmax.f32 %v628_v40, 0.0 }
 0x113   : > { %v1130_v49 = vpack.c.bf16 %v695_v43, %v694_v37  ;;  %v1131_v50 = vpack.c.bf16 %v697_v44, %v696_v38  ;;  %v699_v51 = vmax.f32 %v517_v45, 0.0  ;;  %v701_v52 = vmax.f32 %v630_v46, 0.0 }
 0x115   : > { %934 = vst [vmem:[%s1372_s25 + $0x80] sm:$0xff] %v1130_v49  ;;  %935 = vst [vmem:[%s1372_s25 + $0x88] sm:$0xff] %v1131_v50  ;;  %v1132_v55 = vpack.c.bf16 %v699_v51, %v698_v47  ;;  %v1133_v56 = vpack.c.bf16 %v701_v52, %v700_v48  ;;  %v520_v57 = vpop.f32.mrb[20].mxu0  ;;  %v633_v58 = vpop.f32.mrb[20].mxu1 }
 0x116   : > { %v521_v59 = vadd.f32 %v520_v57, %v304_v54  ;;  %v634_v60 = vadd.f32 %v633_v58, %v304_v54  ;;  %v522_v61 = vpop.f32.mrb[21].mxu0  ;;  %v635_v62 = vpop.f32.mrb[21].mxu1 }
 0x117   : > { %936 = vst [vmem:[%s1372_s25 + $0x90] sm:$0xff] %v1132_v55  ;;  %937 = vst [vmem:[%s1372_s25 + $0x98] sm:$0xff] %v1133_v56  ;;  %v523_v63 = vadd.f32 %v522_v61, %v304_v54  ;;  %v636_v0 = vadd.f32 %v635_v62, %v304_v54  ;;  %v524_v1 = vpop.f32.mrb[22].mxu0  ;;  %v637_v2 = vpop.f32.mrb[22].mxu1 }
 0x118   : > { %v702_v3 = vmax.f32 %v521_v59, 0.0  ;;  %v704_v4 = vmax.f32 %v634_v60, 0.0  ;;  %v525_v5 = vadd.f32 %v524_v1, %v309_v53  ;;  %v638_v6 = vadd.f32 %v637_v2, %v309_v53  ;;  %v526_v7 = vpop.f32.mrb[23].mxu0  ;;  %v639_v8 = vpop.f32.mrb[23].mxu1 }
 0x119   : > { %v703_v9 = vmax.f32 %v523_v63, 0.0  ;;  %v705_v10 = vmax.f32 %v636_v0, 0.0  ;;  %v527_v11 = vadd.f32 %v526_v7, %v309_v53  ;;  %v640_v12 = vadd.f32 %v639_v8, %v309_v53  ;;  %v329_v49 = vpop.permute.xlu1 %328  ;;  %v324_v50 = vpop.permute.xlu0 %323 }
 0x11a   : > { %v706_v13 = vmax.f32 %v525_v5, 0.0  ;;  %v708_v14 = vmax.f32 %v638_v6, 0.0 }
 0x11b   : > { %v1134_v15 = vpack.c.bf16 %v703_v9, %v702_v3  ;;  %v1135_v16 = vpack.c.bf16 %v705_v10, %v704_v4  ;;  %v707_v17 = vmax.f32 %v527_v11, 0.0  ;;  %v709_v18 = vmax.f32 %v640_v12, 0.0 }
 0x11d   : > { %938 = vst [vmem:[%s1372_s25 + $0xa0] sm:$0xff] %v1134_v15  ;;  %939 = vst [vmem:[%s1372_s25 + $0xa8] sm:$0xff] %v1135_v16  ;;  %v1136_v21 = vpack.c.bf16 %v707_v17, %v706_v13  ;;  %v1137_v22 = vpack.c.bf16 %v709_v18, %v708_v14  ;;  %v530_v23 = vpop.f32.mrb[24].mxu0  ;;  %v643_v24 = vpop.f32.mrb[24].mxu1 }
 0x11e   : > { %v531_v25 = vadd.f32 %v530_v23, %v314_v20  ;;  %v644_v26 = vadd.f32 %v643_v24, %v314_v20  ;;  %v532_v27 = vpop.f32.mrb[25].mxu0  ;;  %v645_v28 = vpop.f32.mrb[25].mxu1 }
 0x11f   : > { %940 = vst [vmem:[%s1372_s25 + $0xb0] sm:$0xff] %v1136_v21  ;;  %941 = vst [vmem:[%s1372_s25 + $0xb8] sm:$0xff] %v1137_v22  ;;  %v533_v29 = vadd.f32 %v532_v27, %v314_v20  ;;  %v646_v30 = vadd.f32 %v645_v28, %v314_v20  ;;  %v534_v31 = vpop.f32.mrb[26].mxu0  ;;  %v647_v32 = vpop.f32.mrb[26].mxu1 }
 0x120   : > { %v710_v33 = vmax.f32 %v531_v25, 0.0  ;;  %v712_v34 = vmax.f32 %v644_v26, 0.0  ;;  %v535_v35 = vadd.f32 %v534_v31, %v319_v19  ;;  %v648_v36 = vadd.f32 %v647_v32, %v319_v19  ;;  %v536_v37 = vpop.f32.mrb[27].mxu0  ;;  %v649_v38 = vpop.f32.mrb[27].mxu1 }
 0x121   : > { %v711_v39 = vmax.f32 %v533_v29, 0.0  ;;  %v713_v40 = vmax.f32 %v646_v30, 0.0  ;;  %v537_v41 = vadd.f32 %v536_v37, %v319_v19  ;;  %v650_v42 = vadd.f32 %v649_v38, %v319_v19 }
 0x122   : > { %v714_v43 = vmax.f32 %v535_v35, 0.0  ;;  %v716_v44 = vmax.f32 %v648_v36, 0.0 }
 0x123   : > { %v1138_v45 = vpack.c.bf16 %v711_v39, %v710_v33  ;;  %v1139_v46 = vpack.c.bf16 %v713_v40, %v712_v34  ;;  %v715_v47 = vmax.f32 %v537_v41, 0.0  ;;  %v717_v48 = vmax.f32 %v650_v42, 0.0 }
 0x125   : > { %942 = vst [vmem:[%s1372_s25 + $0xc0] sm:$0xff] %v1138_v45  ;;  %943 = vst [vmem:[%s1372_s25 + $0xc8] sm:$0xff] %v1139_v46  ;;  %v1140_v51 = vpack.c.bf16 %v715_v47, %v714_v43  ;;  %v1141_v52 = vpack.c.bf16 %v717_v48, %v716_v44  ;;  %v540_v53 = vpop.f32.mrb[28].mxu0  ;;  %v653_v54 = vpop.f32.mrb[28].mxu1 }
 0x126   : > { %v541_v55 = vadd.f32 %v540_v53, %v324_v50  ;;  %v654_v56 = vadd.f32 %v653_v54, %v324_v50  ;;  %v542_v57 = vpop.f32.mrb[29].mxu0  ;;  %v655_v58 = vpop.f32.mrb[29].mxu1 }
 0x127   : > { %944 = vst [vmem:[%s1372_s25 + $0xd0] sm:$0xff] %v1140_v51  ;;  %945 = vst [vmem:[%s1372_s25 + $0xd8] sm:$0xff] %v1141_v52  ;;  %v543_v59 = vadd.f32 %v542_v57, %v324_v50  ;;  %v656_v60 = vadd.f32 %v655_v58, %v324_v50  ;;  %v544_v61 = vpop.f32.mrb[30].mxu0  ;;  %v657_v62 = vpop.f32.mrb[30].mxu1 }
 0x128   : > { %v718_v63 = vmax.f32 %v541_v55, 0.0  ;;  %v720_v0 = vmax.f32 %v654_v56, 0.0  ;;  %v545_v1 = vadd.f32 %v544_v61, %v329_v49  ;;  %v658_v2 = vadd.f32 %v657_v62, %v329_v49  ;;  %v546_v3 = vpop.f32.mrb[31].mxu0  ;;  %v659_v4 = vpop.f32.mrb[31].mxu1 }
 0x129   : > { %v719_v5 = vmax.f32 %v543_v59, 0.0  ;;  %v721_v6 = vmax.f32 %v656_v60, 0.0  ;;  %v547_v7 = vadd.f32 %v546_v3, %v329_v49  ;;  %v660_v8 = vadd.f32 %v659_v4, %v329_v49 }
 0x12a   : > { %v722_v9 = vmax.f32 %v545_v1, 0.0  ;;  %v724_v10 = vmax.f32 %v658_v2, 0.0 }
 0x12b   : > { %v1142_v11 = vpack.c.bf16 %v719_v5, %v718_v63  ;;  %v1143_v12 = vpack.c.bf16 %v721_v6, %v720_v0  ;;  %v723_v13 = vmax.f32 %v547_v7, 0.0  ;;  %v725_v14 = vmax.f32 %v660_v8, 0.0 }
 0x12d   : > { %946 = vst [vmem:[%s1372_s25 + $0xe0] sm:$0xff] %v1142_v11  ;;  %947 = vst [vmem:[%s1372_s25 + $0xe8] sm:$0xff] %v1143_v12  ;;  %v1144_v15 = vpack.c.bf16 %v723_v13, %v722_v9  ;;  %v1145_v16 = vpack.c.bf16 %v725_v14, %v724_v10 }
 0x12f   : > { %948 = vst [vmem:[%s1372_s25 + $0xf0] sm:$0xff] %v1144_v15  ;;  %949 = vst [vmem:[%s1372_s25 + $0xf8] sm:$0xff] %v1145_v16 }
 0x130 PF: > { %s13_s14 = sadd.s32 1, %s1215_s14   ;;  %s1419_s12 = smov %s1211_s13 }
 0x131   : > { %p10_p5 = scmp.ge.s32.totalorder %s13_s14, 4   ;;  %s1420_s13 = smov %s1422_s15 }
 0x133   :  { %12 = sbr.rel (!%p10_p5) target bundleno = 2 (0x2), region = 62 }

</bundles_post_ra>
